<compile_context>
chip_gen: v6e
topology: v6e:2x2x1
jax: 0.10.0
libtpu: 0.0.40
codegen_flags: <defaults>
</compile_context>

<pallas_src>
import functools

import jax
import jax.numpy as jnp
from jax.experimental import pallas as pl
from jax.experimental.pallas import tpu as pltpu

LANE = 128

# bf16 matmul inputs (f32 accumulation) only on TPU; plain f32 elsewhere so
# the script also runs under CPU / interpret backends.
_ON_TPU = jax.default_backend() == "tpu"
DEFAULT_COMPUTE_DTYPE = jnp.bfloat16 if _ON_TPU else jnp.float32


def _round_up(n, m):
    return ((n + m - 1) // m) * m


def _const_spec(shape):
    """BlockSpec for an operand whose block never changes across the grid.

    Single-buffered (pl.Buffered(1)) when the installed JAX supports
    pipeline_mode; falls back to a plain BlockSpec otherwise.
    """
    idx = lambda *_args, n=len(shape): (0,) * n
    try:
        return pl.BlockSpec(shape, idx, pipeline_mode=pl.Buffered(1))
    except TypeError:  # older BlockSpec without pipeline_mode kwarg
        return pl.BlockSpec(shape, idx)


def _vmem_limit_bytes(est):
    cap = 64 * 2 ** 20  # assume the most restrictive part (v7x per-TC VMEM)
    try:
        cap = int(getattr(pltpu.get_tpu_info(), "vmem_capacity_bytes", cap))
    except Exception:
        pass
    hi = max(cap - 8 * 2 ** 20, 16 * 2 ** 20)   # leave headroom for the compiler
    return int(min(hi, max(32 * 2 ** 20, 2 * est)))


# ------------------------------ kernel body ---------------------------------

def temporal_block_kernel(x_ref, w1_ref, b1_ref, w2_ref, b2_ref, *rest,
                          kernel_size, dilation, has_downsample,
                          num_time_blocks):
    """One (batch-block, time-tile) per grid step.

    x_ref   : (Bb, tT, Cpi)    compute dtype, channels-last, channel-padded
    w1_ref  : (K, Cpi, Cpo)    compute dtype, per-tap conv1 weight
    b1_ref  : (1, Cpo)         f32
    w2_ref  : (K, Cpo, Cpo)    compute dtype
    b2_ref  : (1, Cpo)         f32
    [wd_ref : (Cpi, Cpo), bd_ref : (1, Cpo)]  only when downsampling
    out_ref : (Bb, tT, Cpo)    compute dtype
    scratch : xpad (Bb, tT+P, Cpi), hpad (Bb, tT+P, Cpo)  compute dtype
              rows [0, P) carry the previous time tile's last P rows.
    """
    if has_downsample:
        wd_ref, bd_ref, out_ref, xpad_ref, hpad_ref = rest
    else:
        out_ref, xpad_ref, hpad_ref = rest

    K = kernel_size
    P = dilation * (K - 1)
    Bb, tT, cpi = x_ref.shape
    cpo = out_ref.shape[2]
    cdt = x_ref.dtype
    t = pl.program_id(1)

    x_val = x_ref[...]                                   # (Bb, tT, Cpi)

    if P > 0:
        # Zero the causal left-context at the first time tile of each batch
        # block.  (Runs per batch block, so it is correct even when the batch
        # axis is split across TensorCores.)
        @pl.when(t == 0)
        def _zero_ctx():
            xpad_ref[:, 0:P, :] = jnp.zeros((Bb, P, cpi), cdt)
            hpad_ref[:, 0:P, :] = jnp.zeros((Bb, P, cpo), cdt)

        xpad_ref[:, P:P + tT, :] = x_val

    def causal_conv(pad_ref, cur2, w_ref, b_ref, cin):
        # K accumulating MXU matmuls, one per dilated tap (no im2col copy).
        # Tap K-1 (shift 0) reuses the already-loaded value `cur2`.
        acc = jnp.dot(cur2, w_ref[K - 1], preferred_element_type=jnp.float32)
        for k in range(K - 1):
            tap = pad_ref[:, k * dilation:k * dilation + tT, :]
            acc = acc + jnp.dot(tap.reshape(Bb * tT, cin), w_ref[k],
                                preferred_element_type=jnp.float32)
        return acc + b_ref[...]                           # (Bb*tT, Cpo) f32

    x2 = x_val.reshape(Bb * tT, cpi)

    # conv1 -> chomp (causal pad) -> relu ; dropout1 identity at inference
    h = jnp.maximum(causal_conv(xpad_ref, x2, w1_ref, b1_ref, cpi), 0.0)
    h_c = h.astype(cdt)

    if P > 0:
        hpad_ref[:, P:P + tT, :] = h_c.reshape(Bb, tT, cpo)

    # conv2 -> chomp -> relu ; dropout2 identity at inference
    out2 = jnp.maximum(causal_conv(hpad_ref, h_c, w2_ref, b2_ref, cpo), 0.0)

    # residual (1x1 downsample conv when C_in != C_out, identity otherwise)
    if has_downsample:
        res = jnp.dot(x2, wd_ref[...],
                      preferred_element_type=jnp.float32) + bd_ref[...]
    else:
        res = x2.astype(jnp.float32)

    outv = jnp.maximum(out2 + res, 0.0)
    out_ref[...] = outv.reshape(Bb, tT, cpo).astype(out_ref.dtype)

    # Carry the last P rows of [context | tile] into the context region for
    # the next (sequential) time tile.
    if P > 0 and num_time_blocks > 1:
        x_tail = xpad_ref[:, tT:tT + P, :]
        h_tail = hpad_ref[:, tT:tT + P, :]
        xpad_ref[:, 0:P, :] = x_tail
        hpad_ref[:, 0:P, :] = h_tail


# ------------------------------ host wrapper --------------------------------

def _pick_batch_block(B, T, batch_block):
    if batch_block is not None:
        assert B % batch_block == 0
        return batch_block
    # Fold batch elements into the matmul M dim (~1024 rows/step).  No forced
    # ">=2 grid steps": on single-TC v5e/v6e the grid is a serial loop.
    target_rows = 1024
    bb = max(1, min(B, max(1, target_rows // max(T, 1))))
    while B % bb:
        bb -= 1
    return bb


def _pick_time_block(T, P, Bb, cpi, cpo, itemsize, time_block):
    if time_block is not None:
        assert T % time_block == 0
        assert time_block % 8 == 0 or time_block == T
        return time_block

    budget = 20 * 2 ** 20   # per-step activation residency target (fits v7x)

    def step_bytes(tT):
        return (2 * Bb * tT * (cpi + cpo) * itemsize          # x/out blocks
                + Bb * (tT + P) * (cpi + cpo) * itemsize      # pad scratch
                + 3 * Bb * tT * cpo * 4)                      # f32 accumulators

    tT = T
    while tT % 2 == 0 and (tT // 2) % 8 == 0 and step_bytes(tT) > budget:
        tT //= 2
    return tT


def pad_params(params, compute_dtype=DEFAULT_COMPUTE_DTYPE):
    """Channel-pad (to multiples of 128) and cast the folded parameters."""
    K, Cin, Cout = params["w1"].shape
    cpi = _round_up(Cin, LANE)
    cpo = _round_up(Cout, LANE)

    def pad_w(w, ci, co):
        out = jnp.zeros((w.shape[0], ci, co), compute_dtype)
        return out.at[:, :w.shape[1], :w.shape[2]].set(w.astype(compute_dtype))

    def pad_b(b):
        return jnp.zeros((1, cpo), jnp.float32).at[:, :b.shape[1]].set(
            b.astype(jnp.float32))

    pp = dict(w1=pad_w(params["w1"], cpi, cpo), b1=pad_b(params["b1"]),
              w2=pad_w(params["w2"], cpo, cpo), b2=pad_b(params["b2"]),
              wd=None, bd=None, cin=Cin, cout=Cout, cpi=cpi, cpo=cpo)
    if params.get("wd") is not None:
        pp["wd"] = jnp.zeros((cpi, cpo), compute_dtype).at[:Cin, :Cout].set(
            params["wd"].astype(compute_dtype))
        pp["bd"] = pad_b(params["bd"])
    return pp


def temporal_block_ntc(x_ntc, pp, *, kernel_size, dilation,
                       batch_block=None, time_block=None):
    """Kernel entry on channels-last, channel-padded activations.

    x_ntc: (B, T, Cpi) in the compute dtype.  Returns (B, T, Cpo) in the same
    dtype.  Stacked TemporalBlocks should chain this directly so the NCW<->NTC
    transpose + channel pad/slice only happens at the network boundary.
    """
    B, T, cpi = x_ntc.shape
    assert cpi == pp["cpi"]
    cpo = pp["cpo"]
    K = kernel_size
    P = dilation * (K - 1)
    has_downsample = pp["wd"] is not None
    cdt = x_ntc.dtype
    itemsize = jnp.dtype(cdt).itemsize

    Bb = _pick_batch_block(B, T, batch_block)
    tT = _pick_time_block(T, P, Bb, cpi, cpo, itemsize, time_block)
    nt = T // tT
    grid = (B // Bb, nt)

    inputs = [x_ntc, pp["w1"], pp["b1"], pp["w2"], pp["b2"]]
    in_specs = [
        pl.BlockSpec((Bb, tT, cpi), lambda i, t: (i, t, 0)),
        _const_spec((K, cpi, cpo)),
        _const_spec((1, cpo)),
        _const_spec((K, cpo, cpo)),
        _const_spec((1, cpo)),
    ]
    if has_downsample:
        inputs += [pp["wd"], pp["bd"]]
        in_specs += [_const_spec((cpi, cpo)), _const_spec((1, cpo))]

    # VMEM budget: double-buffered x/out blocks, single-buffered weights,
    # pad scratch, plus in-flight tap values and f32 accumulators.
    est = (2 * Bb * tT * cpi * itemsize
           + 2 * Bb * tT * cpo * itemsize
           + (K * cpi * cpo + K * cpo * cpo
              + (cpi * cpo if has_downsample else 0)) * itemsize
           + 4 * cpo * 4
           + Bb * (tT + P) * (cpi + cpo) * itemsize
           + Bb * tT * (cpi + cpo) * itemsize
           + 3 * Bb * tT * cpo * 4)

    kernel = functools.partial(
        temporal_block_kernel, kernel_size=K, dilation=dilation,
        has_downsample=has_downsample, num_time_blocks=nt)

    return pl.pallas_call(
        kernel,
        out_shape=jax.ShapeDtypeStruct((B, T, cpo), cdt),
        grid_spec=pltpu.PrefetchScalarGridSpec(
            num_scalar_prefetch=0,
            grid=grid,
            in_specs=in_specs,
            out_specs=pl.BlockSpec((Bb, tT, cpo), lambda i, t: (i, t, 0)),
            scratch_shapes=[pltpu.VMEM((Bb, tT + P, cpi), cdt),
                            pltpu.VMEM((Bb, tT + P, cpo), cdt)],
        ),
        compiler_params=pltpu.CompilerParams(
            dimension_semantics=("parallel", "arbitrary"),
            vmem_limit_bytes=_vmem_limit_bytes(est)),
    )(*inputs)


def temporal_block(x, params, *, kernel_size, dilation, batch_block=None,
                   time_block=None, compute_dtype=DEFAULT_COMPUTE_DTYPE):
    """x: (B, C_in, T) NCW like PyTorch.  Returns (B, C_out, T)."""
    B, Cin, T = x.shape
    pp = pad_params(params, compute_dtype)
    x_ntc = jnp.transpose(x, (0, 2, 1)).astype(compute_dtype)
    x_ntc = jnp.pad(x_ntc, ((0, 0), (0, 0), (0, pp["cpi"] - Cin)))
    out = temporal_block_ntc(x_ntc, pp, kernel_size=kernel_size,
                             dilation=dilation, batch_block=batch_block,
                             time_block=time_block)
    return jnp.transpose(out[:, :, :pp["cout"]], (0, 2, 1)).astype(x.dtype)


# ------------------------- parameter construction ---------------------------

def make_params(key, n_inputs, n_outputs, kernel_size):
    """weight_norm-folded params (v ~ N(0, 0.01), g = ||v|| like PyTorch init)."""
    k1, k2, k3, k4, k5, k6 = jax.random.split(key, 6)

    def wn_fold(v):   # v: (C_out, C_in, K) PyTorch Conv1d layout
        norm = jnp.sqrt(jnp.sum(v * v, axis=(1, 2), keepdims=True))
        g = norm                      # at init g = ||v|| -> effective weight = v
        return g * v / norm

    v1 = 0.01 * jax.random.normal(k1, (n_outputs, n_inputs, kernel_size), jnp.float32)
    v2 = 0.01 * jax.random.normal(k2, (n_outputs, n_outputs, kernel_size), jnp.float32)
    w1 = jnp.transpose(wn_fold(v1), (2, 1, 0))   # (K, C_in, C_out)
    w2 = jnp.transpose(wn_fold(v2), (2, 1, 0))   # (K, C_out, C_out)

    b1 = 0.05 * jax.random.normal(k4, (1, n_outputs), jnp.float32)
    b2 = 0.05 * jax.random.normal(k5, (1, n_outputs), jnp.float32)

    params = dict(w1=w1, b1=b1, w2=w2, b2=b2, wd=None, bd=None)
    if n_inputs != n_outputs:   # PyTorch: downsample = Conv1d(Cin, Cout, 1) else None
        wd = 0.01 * jax.random.normal(k3, (n_outputs, n_inputs), jnp.float32)
        params["wd"] = jnp.transpose(wd, (1, 0))            # (C_in, C_out)
        params["bd"] = 0.05 * jax.random.normal(k6, (1, n_outputs), jnp.float32)
    return params


# ----------------------------- pure-JAX reference ---------------------------

def ref_forward(x, params, kernel_size, dilation,
                compute_dtype=DEFAULT_COMPUTE_DTYPE):
    """Mirrors the kernel's numerics (compute-dtype matmuls, f32 accumulate)."""
    K = kernel_size
    P = dilation * (K - 1)
    cdt = compute_dtype

    def causal_conv(inp_ntc, w, b):            # inp (B,T,C); w (K,Cin,Cout)
        B, T, _ = inp_ntc.shape
        xp = jnp.pad(inp_ntc, ((0, 0), (P, 0), (0, 0)))
        acc = jnp.zeros((B, T, w.shape[2]), jnp.float32)
        for k in range(K):
            seg = xp[:, k * dilation:k * dilation + T, :]
            acc = acc + jnp.einsum("btc,co->bto", seg, w[k].astype(cdt),
                                   preferred_element_type=jnp.float32)
        return acc + b[0][None, None, :]

    x_ntc = jnp.transpose(x, (0, 2, 1)).astype(cdt)
    h = jax.nn.relu(causal_conv(x_ntc, params["w1"], params["b1"])).astype(cdt)
    o = jax.nn.relu(causal_conv(h, params["w2"], params["b2"]))
    if params.get("wd") is not None:
        res = jnp.einsum("btc,co->bto", x_ntc, params["wd"].astype(cdt),
                         preferred_element_type=jnp.float32)
        res = res + params["bd"][0][None, None, :]
    else:
        res = x_ntc.astype(jnp.float32)        # kernel feeds x through cdt
    out = jax.nn.relu(o + res).astype(cdt)     # mirror the kernel's output cast
    return jnp.transpose(out, (0, 2, 1)).astype(x.dtype)


# ------------------------------------ main ----------------------------------

if __name__ == "__main__":
    key = jax.random.PRNGKey(0)
    atol = 2e-2 if DEFAULT_COMPUTE_DTYPE == jnp.bfloat16 else 1e-4

    def check(out, ref):
        assert jnp.allclose(out, ref, atol=atol, rtol=1e-3), \
            f"mismatch vs reference (max abs diff {float(jnp.max(jnp.abs(out - ref)))})"

    # ---- config 1: C_in != C_out  ->  1x1 downsample residual --------------
    B, Cin, Cout, T = 4, 4, 8, 16
    kernel_size, dilation = 3, 2           # padding = dilation*(K-1) = 4
    kx, kp, key = jax.random.split(key, 3)
    x = jax.random.normal(kx, (B, Cin, T), jnp.float32)
    params = make_params(kp, Cin, Cout, kernel_size)
    out = jax.block_until_ready(
        temporal_block(x, params, kernel_size=kernel_size, dilation=dilation))
    assert out.shape == (B, Cout, T)
    check(out, ref_forward(x, params, kernel_size, dilation))

    # ---- config 2: C_in == C_out  ->  identity residual (downsample=None) --
    B2, C2, T2, K2, dil2 = 2, 8, 16, 2, 1
    kx2, kp2, key = jax.random.split(key, 3)
    x2 = jax.random.normal(kx2, (B2, C2, T2), jnp.float32)
    params2 = make_params(kp2, C2, C2, K2)
    out2 = jax.block_until_ready(
        temporal_block(x2, params2, kernel_size=K2, dilation=dil2))
    assert out2.shape == (B2, C2, T2)
    check(out2, ref_forward(x2, params2, K2, dil2))

    # ---- config 3: time-tiled path (carried causal context across tiles) ---
    B3, C3, T3, K3, dil3 = 2, 8, 32, 3, 2      # P = 4, two 16-step time tiles
    kx3, kp3, _ = jax.random.split(key, 3)
    x3 = jax.random.normal(kx3, (B3, C3, T3), jnp.float32)
    params3 = make_params(kp3, C3, C3, K3)
    out3 = jax.block_until_ready(
        temporal_block(x3, params3, kernel_size=K3, dilation=dil3,
                       time_block=16))
    assert out3.shape == (B3, C3, T3)
    check(out3, ref_forward(x3, params3, K3, dil3))

    print("KERNEL_OK")
</pallas_src>

<mosaic_0001>
module attributes {stable_mosaic.version = 11 : i64} {
  func.func @temporal_block_kernel(%arg0: i32, %arg1: i32, %arg2: memref<4x16x128xf32, #tpu.memory_space<vmem>>, %arg3: memref<3x128x128xf32, #tpu.memory_space<vmem>>, %arg4: memref<1x128xf32, #tpu.memory_space<vmem>>, %arg5: memref<3x128x128xf32, #tpu.memory_space<vmem>>, %arg6: memref<1x128xf32, #tpu.memory_space<vmem>>, %arg7: memref<128x128xf32, #tpu.memory_space<vmem>>, %arg8: memref<1x128xf32, #tpu.memory_space<vmem>>, %arg9: memref<4x16x128xf32, #tpu.memory_space<vmem>>, %arg10: memref<4x20x128xf32, #tpu.memory_space<vmem>>, %arg11: memref<4x20x128xf32, #tpu.memory_space<vmem>>) attributes {dimension_semantics = [#tpu.dimension_semantics<parallel>, #tpu.dimension_semantics<arbitrary>], iteration_bounds = array<i64: 1, 1>, scalar_prefetch = 0 : i64, scratch_operands = 2 : i64, tpu.core_type = #tpu.core_type<tc>, window_params = [{transform_indices = @transform_0, window_bounds = array<i64: 4, 16, 128>}, {pipeline_mode = #tpu.pipeline_mode<synchronous>, transform_indices = @transform_1, window_bounds = array<i64: 3, 128, 128>}, {pipeline_mode = #tpu.pipeline_mode<synchronous>, transform_indices = @transform_2, window_bounds = array<i64: 1, 128>}, {pipeline_mode = #tpu.pipeline_mode<synchronous>, transform_indices = @transform_3, window_bounds = array<i64: 3, 128, 128>}, {pipeline_mode = #tpu.pipeline_mode<synchronous>, transform_indices = @transform_4, window_bounds = array<i64: 1, 128>}, {pipeline_mode = #tpu.pipeline_mode<synchronous>, transform_indices = @transform_5, window_bounds = array<i64: 128, 128>}, {pipeline_mode = #tpu.pipeline_mode<synchronous>, transform_indices = @transform_6, window_bounds = array<i64: 1, 128>}, {transform_indices = @transform_7, window_bounds = array<i64: 4, 16, 128>}]} {
    %c0 = arith.constant 0 : index
    %c0_0 = arith.constant 0 : index
    %c0_1 = arith.constant 0 : index
    %0 = vector.load %arg2[%c0, %c0_0, %c0_1] : memref<4x16x128xf32, #tpu.memory_space<vmem>>, vector<4x16x128xf32>
    %c0_i32 = arith.constant 0 : i32
    %1 = arith.cmpi eq, %arg1, %c0_i32 : i32
    %2 = arith.extui %1 : i1 to i32
    %c0_i32_2 = arith.constant 0 : i32
    %3 = arith.cmpi ne, %2, %c0_i32_2 : i32
    scf.if %3 {
      %cst_56 = arith.constant 0.000000e+00 : f32
      %58 = vector.broadcast %cst_56 : f32 to vector<4x4x128xf32>
      %c0_57 = arith.constant 0 : index
      %c0_58 = arith.constant 0 : index
      %c0_59 = arith.constant 0 : index
      %59 = vector.load %arg10[%c0_57, %c0_58, %c0_59] : memref<4x20x128xf32, #tpu.memory_space<vmem>>, vector<4x4x128xf32>
      tpu.vector_store %arg10[%c0_57, %c0_58, %c0_59], %58 {strides = array<i32>} : memref<4x20x128xf32, #tpu.memory_space<vmem>>, vector<4x4x128xf32>,
      %cst_60 = arith.constant 0.000000e+00 : f32
      %60 = vector.broadcast %cst_60 : f32 to vector<4x4x128xf32>
      %c0_61 = arith.constant 0 : index
      %c0_62 = arith.constant 0 : index
      %c0_63 = arith.constant 0 : index
      %61 = vector.load %arg11[%c0_61, %c0_62, %c0_63] : memref<4x20x128xf32, #tpu.memory_space<vmem>>, vector<4x4x128xf32>
      tpu.vector_store %arg11[%c0_61, %c0_62, %c0_63], %60 {strides = array<i32>} : memref<4x20x128xf32, #tpu.memory_space<vmem>>, vector<4x4x128xf32>,
    } else {
    }
    %c0_3 = arith.constant 0 : index
    %c4 = arith.constant 4 : index
    %c0_4 = arith.constant 0 : index
    %4 = vector.load %arg10[%c0_3, %c4, %c0_4] : memref<4x20x128xf32, #tpu.memory_space<vmem>>, vector<4x16x128xf32>
    tpu.vector_store %arg10[%c0_3, %c4, %c0_4], %0 {strides = array<i32>} : memref<4x20x128xf32, #tpu.memory_space<vmem>>, vector<4x16x128xf32>,
    %5 = vector.shape_cast %0 : vector<4x16x128xf32> to vector<64x128xf32>
    %c2 = arith.constant 2 : index
    %c0_5 = arith.constant 0 : index
    %c0_6 = arith.constant 0 : index
    %6 = vector.load %arg3[%c2, %c0_5, %c0_6] : memref<3x128x128xf32, #tpu.memory_space<vmem>>, vector<1x128x128xf32>
    %7 = vector.shape_cast %6 : vector<1x128x128xf32> to vector<128x128xf32>
    %cst = arith.constant dense<0.000000e+00> : vector<64x128xf32>
    %8 = tpu.matmul %5, %7, %cst {dimension_numbers = #tpu.dot_dimension_numbers<[1], [0], [0], [1], [0, 0, 1, 1], [], []>} : vector<64x128xf32>, vector<128x128xf32>, vector<64x128xf32> -> vector<64x128xf32>
    %c0_7 = arith.constant 0 : index
    %c0_8 = arith.constant 0 : index
    %c0_9 = arith.constant 0 : index
    %9 = vector.load %arg10[%c0_7, %c0_8, %c0_9] : memref<4x20x128xf32, #tpu.memory_space<vmem>>, vector<4x16x128xf32>
    %10 = vector.shape_cast %9 : vector<4x16x128xf32> to vector<64x128xf32>
    %c0_10 = arith.constant 0 : index
    %c0_11 = arith.constant 0 : index
    %c0_12 = arith.constant 0 : index
    %11 = vector.load %arg3[%c0_10, %c0_11, %c0_12] : memref<3x128x128xf32, #tpu.memory_space<vmem>>, vector<1x128x128xf32>
    %12 = vector.shape_cast %11 : vector<1x128x128xf32> to vector<128x128xf32>
    %cst_13 = arith.constant dense<0.000000e+00> : vector<64x128xf32>
    %13 = tpu.matmul %10, %12, %cst_13 {dimension_numbers = #tpu.dot_dimension_numbers<[1], [0], [0], [1], [0, 0, 1, 1], [], []>} : vector<64x128xf32>, vector<128x128xf32>, vector<64x128xf32> -> vector<64x128xf32>
    %14 = arith.addf %8, %13 : vector<64x128xf32>
    %c0_14 = arith.constant 0 : index
    %c2_15 = arith.constant 2 : index
    %c0_16 = arith.constant 0 : index
    %15 = vector.load %arg10[%c0_14, %c2_15, %c0_16] : memref<4x20x128xf32, #tpu.memory_space<vmem>>, vector<4x16x128xf32>
    %16 = vector.shape_cast %15 : vector<4x16x128xf32> to vector<64x128xf32>
    %c1 = arith.constant 1 : index
    %c0_17 = arith.constant 0 : index
    %c0_18 = arith.constant 0 : index
    %17 = vector.load %arg3[%c1, %c0_17, %c0_18] : memref<3x128x128xf32, #tpu.memory_space<vmem>>, vector<1x128x128xf32>
    %18 = vector.shape_cast %17 : vector<1x128x128xf32> to vector<128x128xf32>
    %cst_19 = arith.constant dense<0.000000e+00> : vector<64x128xf32>
    %19 = tpu.matmul %16, %18, %cst_19 {dimension_numbers = #tpu.dot_dimension_numbers<[1], [0], [0], [1], [0, 0, 1, 1], [], []>} : vector<64x128xf32>, vector<128x128xf32>, vector<64x128xf32> -> vector<64x128xf32>
    %20 = arith.addf %14, %19 : vector<64x128xf32>
    %c0_20 = arith.constant 0 : index
    %c0_21 = arith.constant 0 : index
    %21 = vector.load %arg4[%c0_20, %c0_21] : memref<1x128xf32, #tpu.memory_space<vmem>>, vector<1x128xf32>
    %22 = vector.broadcast %21 : vector<1x128xf32> to vector<64x128xf32>
    %23 = arith.addf %20, %22 : vector<64x128xf32>
    %cst_22 = arith.constant 0.000000e+00 : f32
    %24 = vector.broadcast %cst_22 : f32 to vector<64x128xf32>
    %25 = arith.maximumf %23, %24 : vector<64x128xf32>
    %26 = vector.shape_cast %25 : vector<64x128xf32> to vector<4x16x128xf32>
    %c0_23 = arith.constant 0 : index
    %c4_24 = arith.constant 4 : index
    %c0_25 = arith.constant 0 : index
    %27 = vector.load %arg11[%c0_23, %c4_24, %c0_25] : memref<4x20x128xf32, #tpu.memory_space<vmem>>, vector<4x16x128xf32>
    tpu.vector_store %arg11[%c0_23, %c4_24, %c0_25], %26 {strides = array<i32>} : memref<4x20x128xf32, #tpu.memory_space<vmem>>, vector<4x16x128xf32>,
    %c2_26 = arith.constant 2 : index
    %c0_27 = arith.constant 0 : index
    %c0_28 = arith.constant 0 : index
    %28 = vector.load %arg5[%c2_26, %c0_27, %c0_28] : memref<3x128x128xf32, #tpu.memory_space<vmem>>, vector<1x128x128xf32>
    %29 = vector.shape_cast %28 : vector<1x128x128xf32> to vector<128x128xf32>
    %cst_29 = arith.constant dense<0.000000e+00> : vector<64x128xf32>
    %30 = tpu.matmul %25, %29, %cst_29 {dimension_numbers = #tpu.dot_dimension_numbers<[1], [0], [0], [1], [0, 0, 1, 1], [], []>} : vector<64x128xf32>, vector<128x128xf32>, vector<64x128xf32> -> vector<64x128xf32>
    %c0_30 = arith.constant 0 : index
    %c0_31 = arith.constant 0 : index
    %c0_32 = arith.constant 0 : index
    %31 = vector.load %arg11[%c0_30, %c0_31, %c0_32] : memref<4x20x128xf32, #tpu.memory_space<vmem>>, vector<4x16x128xf32>
    %32 = vector.shape_cast %31 : vector<4x16x128xf32> to vector<64x128xf32>
    %c0_33 = arith.constant 0 : index
    %c0_34 = arith.constant 0 : index
    %c0_35 = arith.constant 0 : index
    %33 = vector.load %arg5[%c0_33, %c0_34, %c0_35] : memref<3x128x128xf32, #tpu.memory_space<vmem>>, vector<1x128x128xf32>
    %34 = vector.shape_cast %33 : vector<1x128x128xf32> to vector<128x128xf32>
    %cst_36 = arith.constant dense<0.000000e+00> : vector<64x128xf32>
    %35 = tpu.matmul %32, %34, %cst_36 {dimension_numbers = #tpu.dot_dimension_numbers<[1], [0], [0], [1], [0, 0, 1, 1], [], []>} : vector<64x128xf32>, vector<128x128xf32>, vector<64x128xf32> -> vector<64x128xf32>
    %36 = arith.addf %30, %35 : vector<64x128xf32>
    %c0_37 = arith.constant 0 : index
    %c2_38 = arith.constant 2 : index
    %c0_39 = arith.constant 0 : index
    %37 = vector.load %arg11[%c0_37, %c2_38, %c0_39] : memref<4x20x128xf32, #tpu.memory_space<vmem>>, vector<4x16x128xf32>
    %38 = vector.shape_cast %37 : vector<4x16x128xf32> to vector<64x128xf32>
    %c1_40 = arith.constant 1 : index
    %c0_41 = arith.constant 0 : index
    %c0_42 = arith.constant 0 : index
    %39 = vector.load %arg5[%c1_40, %c0_41, %c0_42] : memref<3x128x128xf32, #tpu.memory_space<vmem>>, vector<1x128x128xf32>
    %40 = vector.shape_cast %39 : vector<1x128x128xf32> to vector<128x128xf32>
    %cst_43 = arith.constant dense<0.000000e+00> : vector<64x128xf32>
    %41 = tpu.matmul %38, %40, %cst_43 {dimension_numbers = #tpu.dot_dimension_numbers<[1], [0], [0], [1], [0, 0, 1, 1], [], []>} : vector<64x128xf32>, vector<128x128xf32>, vector<64x128xf32> -> vector<64x128xf32>
    %42 = arith.addf %36, %41 : vector<64x128xf32>
    %c0_44 = arith.constant 0 : index
    %c0_45 = arith.constant 0 : index
    %43 = vector.load %arg6[%c0_44, %c0_45] : memref<1x128xf32, #tpu.memory_space<vmem>>, vector<1x128xf32>
    %44 = vector.broadcast %43 : vector<1x128xf32> to vector<64x128xf32>
    %45 = arith.addf %42, %44 : vector<64x128xf32>
    %cst_46 = arith.constant 0.000000e+00 : f32
    %46 = vector.broadcast %cst_46 : f32 to vector<64x128xf32>
    %47 = arith.maximumf %45, %46 : vector<64x128xf32>
    %c0_47 = arith.constant 0 : index
    %c0_48 = arith.constant 0 : index
    %48 = vector.load %arg7[%c0_47, %c0_48] : memref<128x128xf32, #tpu.memory_space<vmem>>, vector<128x128xf32>
    %cst_49 = arith.constant dense<0.000000e+00> : vector<64x128xf32>
    %49 = tpu.matmul %5, %48, %cst_49 {dimension_numbers = #tpu.dot_dimension_numbers<[1], [0], [0], [1], [0, 0, 1, 1], [], []>} : vector<64x128xf32>, vector<128x128xf32>, vector<64x128xf32> -> vector<64x128xf32>
    %c0_50 = arith.constant 0 : index
    %c0_51 = arith.constant 0 : index
    %50 = vector.load %arg8[%c0_50, %c0_51] : memref<1x128xf32, #tpu.memory_space<vmem>>, vector<1x128xf32>
    %51 = vector.broadcast %50 : vector<1x128xf32> to vector<64x128xf32>
    %52 = arith.addf %49, %51 : vector<64x128xf32>
    %53 = arith.addf %47, %52 : vector<64x128xf32>
    %cst_52 = arith.constant 0.000000e+00 : f32
    %54 = vector.broadcast %cst_52 : f32 to vector<64x128xf32>
    %55 = arith.maximumf %53, %54 : vector<64x128xf32>
    %56 = vector.shape_cast %55 : vector<64x128xf32> to vector<4x16x128xf32>
    %c0_53 = arith.constant 0 : index
    %c0_54 = arith.constant 0 : index
    %c0_55 = arith.constant 0 : index
    %57 = vector.load %arg9[%c0_53, %c0_54, %c0_55] : memref<4x16x128xf32, #tpu.memory_space<vmem>>, vector<4x16x128xf32>
    tpu.vector_store %arg9[%c0_53, %c0_54, %c0_55], %56 {strides = array<i32>} : memref<4x16x128xf32, #tpu.memory_space<vmem>>, vector<4x16x128xf32>,
    return
  }
  func.func @transform_0(%arg0: i32, %arg1: i32) -> (i32, i32, i32) {
    %c0_i32 = arith.constant 0 : i32
    %c0_i32_0 = arith.constant 0 : i32
    return %arg0, %arg1, %c0_i32 : i32, i32, i32
  }
  func.func @transform_1(%arg0: i32, %arg1: i32) -> (i32, i32, i32) {
    %c0_i32 = arith.constant 0 : i32
    %c0_i32_0 = arith.constant 0 : i32
    %c0_i32_1 = arith.constant 0 : i32
    %c0_i32_2 = arith.constant 0 : i32
    return %c0_i32, %c0_i32_0, %c0_i32_1 : i32, i32, i32
  }
  func.func @transform_2(%arg0: i32, %arg1: i32) -> (i32, i32) {
    %c0_i32 = arith.constant 0 : i32
    %c0_i32_0 = arith.constant 0 : i32
    %c0_i32_1 = arith.constant 0 : i32
    return %c0_i32, %c0_i32_0 : i32, i32
  }
  func.func @transform_3(%arg0: i32, %arg1: i32) -> (i32, i32, i32) {
    %c0_i32 = arith.constant 0 : i32
    %c0_i32_0 = arith.constant 0 : i32
    %c0_i32_1 = arith.constant 0 : i32
    %c0_i32_2 = arith.constant 0 : i32
    return %c0_i32, %c0_i32_0, %c0_i32_1 : i32, i32, i32
  }
  func.func @transform_4(%arg0: i32, %arg1: i32) -> (i32, i32) {
    %c0_i32 = arith.constant 0 : i32
    %c0_i32_0 = arith.constant 0 : i32
    %c0_i32_1 = arith.constant 0 : i32
    return %c0_i32, %c0_i32_0 : i32, i32
  }
  func.func @transform_5(%arg0: i32, %arg1: i32) -> (i32, i32) {
    %c0_i32 = arith.constant 0 : i32
    %c0_i32_0 = arith.constant 0 : i32
    %c0_i32_1 = arith.constant 0 : i32
    return %c0_i32, %c0_i32_0 : i32, i32
  }
  func.func @transform_6(%arg0: i32, %arg1: i32) -> (i32, i32) {
    %c0_i32 = arith.constant 0 : i32
    %c0_i32_0 = arith.constant 0 : i32
    %c0_i32_1 = arith.constant 0 : i32
    return %c0_i32, %c0_i32_0 : i32, i32
  }
  func.func @transform_7(%arg0: i32, %arg1: i32) -> (i32, i32, i32) {
    %c0_i32 = arith.constant 0 : i32
    %c0_i32_0 = arith.constant 0 : i32
    return %arg0, %arg1, %c0_i32 : i32, i32, i32
  }
}

</mosaic_0001>

<bundles_post_ra>
// kernel: tpu_custom_call.1
= control target key start
LH: loop header
LB: loop body
LE: loop exit
PB: predicated region body
PF: predicated region fallthrough
CT: control target
= control target key end

     0   :  { %12 = vsyncpa [#allocation5], 0  ;;  %s1965_s0 = inlined_call_operand.hbm [shape: f32[4,16,128], index: 0, kind: input, shape index: {}]   ;;  %s1966_s1 = inlined_call_operand.hbm [shape: f32[3,128,128], index: 1, kind: input, shape index: {}]   ;;  %s1967_s2 = inlined_call_operand.vmem [shape: f32[1,128], index: 2, kind: input, shape index: {}]   ;;  %s1968_s3 = inlined_call_operand.hbm [shape: f32[3,128,128], index: 3, kind: input, shape index: {}]   ;;  %s1969_s4 = inlined_call_operand.vmem [shape: f32[1,128], index: 4, kind: input, shape index: {}]   ;;  %s1970_s5 = inlined_call_operand.hbm [shape: f32[128,128], index: 5, kind: input, shape index: {}]   ;;  %s1971_s6 = inlined_call_operand.vmem [shape: f32[1,128], index: 6, kind: input, shape index: {}]   ;;  %s1972_s7 = inlined_call_operand.hbm [shape: f32[4,16,128], index: 7, kind: output, shape index: {}]  }
   0x1   :  { %13 = vsyncpa [#allocation8], 0 }
   0x2   :  { %14 = vsyncpa [#allocation11], 0 }
   0x3   :  { %15 = vsyncpa [#allocation6], 0  ;;  %s1740_s24 = smov [#allocation7]   ;;  %s1741_s26 = smov [#allocation4]  }
   0x4   :  { %s33_s25 = sshll.u32 %s1740_s24, 4  ;;  %s21_s27 = sshll.u32 %s1741_s26, 4  ;;  %s34_s25 = int_to_ptr.vmem [resolvable:$true] %s33_s25  ;;  %s22_s27 = int_to_ptr.vmem [resolvable:$true] %s21_s27 }
   0x5   :  { %s1640_s28 = scalar_lea.vmem %s34_s25, 6144  ;;  %p1645_p1 = scmp.lt.s32.totalorder %s34_s25, %s34_s25 }
   0x6   :  { %p1641_p0 = scmp.ne.s32.totalorder %s34_s25, %s1640_s28  ;;  %p1646_p2 = scmp.lt.s32.totalorder %s1640_s28, %s1640_s28 }
   0x8   :  { %p1647_p3 = por %p1646_p2, %p1645_p1 }
   0xa   :  { %p1648_p4 = pnand %p1647_p3, %p1641_p0 }
   0xc   :  { %1651 = shalt.err (!%p1648_p4)
}
   0xd   :  { %s1742_s29 = smov 128   ;;  %s1743_s30 = smov 8  }
   0xe   :  { %39 = dma.hbm_to_vmem [thread:$0]  %s1966_s1, 6144, %s34_s25, [#allocation8], %s1742_s29, %s1742_s29, %s1743_s30  }
   0xf   :  { %s1660_s10 = scalar_lea.vmem %s22_s27, 1024  ;;  %p1665_p6 = scmp.lt.s32.totalorder %s22_s27, %s22_s27 }
  0x10   :  { %p1661_p5 = scmp.ne.s32.totalorder %s22_s27, %s1660_s10  ;;  %p1666_p7 = scmp.lt.s32.totalorder %s1660_s10, %s1660_s10 }
  0x12   :  { %p1667_p8 = por %p1666_p7, %p1665_p6 }
  0x14   :  { %p1668_p9 = pnand %p1667_p8, %p1661_p5 }
  0x16   :  { %1671 = shalt.err (!%p1668_p9)
}
  0x17   :  { %27 = dma.hbm_to_vmem [thread:$0]  %s1965_s0, 1024, %s22_s27, [#allocation5], %s1742_s29, %s1742_s29, %s1743_s30  }
  0x18   :  { %s1744_s13 = smov [#allocation9]   ;;  %s1745_s15 = smov [#allocation10]  }
  0x19   :  { %s47_s14 = sshll.u32 %s1744_s13, 4  ;;  %s61_s16 = sshll.u32 %s1745_s15, 4  ;;  %s48_s14 = int_to_ptr.vmem [resolvable:$true] %s47_s14  ;;  %s62_s16 = int_to_ptr.vmem [resolvable:$true] %s61_s16 }
  0x1a   :  { %s1680_s1 = scalar_lea.vmem %s48_s14, 6144  ;;  %p1685_p11 = scmp.lt.s32.totalorder %s48_s14, %s48_s14 }
  0x1b   :  { %p1681_p10 = scmp.ne.s32.totalorder %s48_s14, %s1680_s1  ;;  %p1686_p12 = scmp.lt.s32.totalorder %s1680_s1, %s1680_s1 }
  0x1d   :  { %p1687_p13 = por %p1686_p12, %p1685_p11 }
  0x1f   :  { %p1688_p0 = pnand %p1687_p13, %p1681_p10 }
  0x21   :  { %1691 = shalt.err (!%p1688_p0)
}
  0x22   :  { %53 = dma.hbm_to_vmem [thread:$0]  %s1968_s3, 6144, %s48_s14, [#allocation8], %s1742_s29, %s1742_s29, %s1743_s30  }
  0x23   :  { %s1700_s0 = scalar_lea.vmem %s62_s16, 2048  ;;  %p1705_p2 = scmp.lt.s32.totalorder %s62_s16, %s62_s16 }
  0x24   :  { %p1701_p1 = scmp.ne.s32.totalorder %s62_s16, %s1700_s0  ;;  %p1706_p3 = scmp.lt.s32.totalorder %s1700_s0, %s1700_s0 }
  0x26   :  { %p1707_p4 = por %p1706_p3, %p1705_p2 }
  0x28   :  { %p1708_p5 = pnand %p1707_p4, %p1701_p1 }
  0x2a   :  { %1711 = shalt.err (!%p1708_p5)
}
  0x2b   :  { %67 = dma.hbm_to_vmem [thread:$0]  %s1970_s5, 2048, %s62_s16, [#allocation11], %s1742_s29, %s1742_s29, %s1743_s30  }
  0x2c   :  { %1732 = dma.done.wait [#allocation5], 1024  }
  0x2d   :  { %1733 = vsyncadd [#allocation5], 4294966272 }
  0x2e   :  { %1734 = dma.done.wait [#allocation8], 12288  }
  0x2f   :  { %1735 = vsyncadd [#allocation8], 4294955008 }
  0x30   :  { %1736 = dma.done.wait [#allocation11], 2048  }
  0x31   :  { %1737 = vsyncadd [#allocation11], 4294965248  ;;  %v1746_v0 = vmov 0.0   ;;  %v150_v1 = vld [vmem:[#allocation7 + $0x78] sm:$0xff]  ;;  %v149_v3 = vld [vmem:[#allocation7 + $0x70] sm:$0xff] }
  0x32   :  { %94 = vst [vmem:[#allocation2] sm:$0xf] %v1746_v0  ;;  %95 = vst [vmem:[#allocation2 + $0x18] sm:$0xf] %v1746_v0  ;;  %v126_v2 = vld [vmem:[#allocation7 + $0x178] sm:$0xff]  ;;  %1284 = vmatprep.subr.mxu0 %v150_v1  ;;  %v125_v4 = vld [vmem:[#allocation7 + $0x170] sm:$0xff] }
  0x33   :  { %96 = vst [vmem:[#allocation2 + $0x30] sm:$0xf] %v1746_v0  ;;  %97 = vst [vmem:[#allocation2 + $0x48] sm:$0xf] %v1746_v0  ;;  %1328 = vmatprep.subr.mxu1 %v126_v2  ;;  %1285 = vmatpush3.msra.mxu0 %v150_v1  ;;  %v148_v5 = vld [vmem:[#allocation7 + $0x68] sm:$0xff]  ;;  %v147_v7 = vld [vmem:[#allocation7 + $0x60] sm:$0xff] }
  0x34   :  { %98 = vst [vmem:[#allocation3] sm:$0xf] %v1746_v0  ;;  %99 = vst [vmem:[#allocation3 + $0x18] sm:$0xf] %v1746_v0  ;;  %1329 = vmatpush3.msra.mxu1 %v126_v2  ;;  %v124_v6 = vld [vmem:[#allocation7 + $0x168] sm:$0xff]  ;;  %1286 = vmatprep.subr.mxu0 %v149_v3  ;;  %v123_v8 = vld [vmem:[#allocation7 + $0x160] sm:$0xff] }
  0x35   :  { %100 = vst [vmem:[#allocation3 + $0x30] sm:$0xf] %v1746_v0  ;;  %101 = vst [vmem:[#allocation3 + $0x48] sm:$0xf] %v1746_v0  ;;  %1330 = vmatprep.subr.mxu1 %v125_v4  ;;  %1287 = vmatpush3.msra.mxu0 %v149_v3  ;;  %v146_v9 = vld [vmem:[#allocation7 + $0x58] sm:$0xff]  ;;  %v145_v11 = vld [vmem:[#allocation7 + $0x50] sm:$0xff] }
  0x36   :  { %1331 = vmatpush3.msra.mxu1 %v125_v4  ;;  %1288 = vmatprep.subr.mxu0 %v148_v5  ;;  %v122_v10 = vld [vmem:[#allocation7 + $0x158] sm:$0xff]  ;;  %v121_v12 = vld [vmem:[#allocation7 + $0x150] sm:$0xff]  ;;  %v144_v13 = vld [vmem:[#allocation7 + $0x48] sm:$0xff] }
  0x37   :  { %1332 = vmatprep.subr.mxu1 %v124_v6  ;;  %1289 = vmatpush3.msra.mxu0 %v148_v5  ;;  %v120_v14 = vld [vmem:[#allocation7 + $0x148] sm:$0xff]  ;;  %v1812_v15 = vld [vmem:[#allocation4] sm:$0xff]  ;;  %v142_v19 = vld [vmem:[#allocation7 + $0x38] sm:$0xff] }
  0x38   :  { %1333 = vmatpush3.msra.mxu1 %v124_v6  ;;  %1290 = vmatprep.subr.mxu0 %v147_v7  ;;  %102 = vst [vmem:[#allocation2 + $0x4] sm:$0xff] %v1812_v15  ;;  %v1815_v16 = vld [vmem:[#allocation4 + $0x8] sm:$0xff]  ;;  %v143_v17 = vld [vmem:[#allocation7 + $0x40] sm:$0xff]  ;;  %v118_v20 = vld [vmem:[#allocation7 + $0x138] sm:$0xff] }
  0x39   :  { %1334 = vmatprep.subr.mxu1 %v123_v8  ;;  %1291 = vmatpush3.msra.mxu0 %v147_v7  ;;  %v119_v18 = vld [vmem:[#allocation7 + $0x140] sm:$0xff]  ;;  %103 = vst [vmem:[#allocation2 + $0xc] sm:$0xff] %v1815_v16  ;;  %v1818_v21 = vld [vmem:[#allocation4 + $0x10] sm:$0xff]  ;;  %v1820_v22 = vld [vmem:[#allocation4 + $0x18] sm:$0xff] }
  0x3a   :  { %1335 = vmatpush3.msra.mxu1 %v123_v8  ;;  %1292 = vmatprep.subr.mxu0 %v146_v9  ;;  %104 = vst [vmem:[#allocation2 + $0x1c] sm:$0xff] %v1818_v21  ;;  %105 = vst [vmem:[#allocation2 + $0x24] sm:$0xff] %v1820_v22  ;;  %v1824_v23 = vld [vmem:[#allocation4 + $0x20] sm:$0xff]  ;;  %v141_v24 = vld [vmem:[#allocation7 + $0x30] sm:$0xff] }
  0x3b   :  { %1336 = vmatprep.subr.mxu1 %v122_v10  ;;  %1293 = vmatpush3.msra.mxu0 %v146_v9  ;;  %v117_v25 = vld [vmem:[#allocation7 + $0x130] sm:$0xff]  ;;  %106 = vst [vmem:[#allocation2 + $0x34] sm:$0xff] %v1824_v23  ;;  %v1827_v26 = vld [vmem:[#allocation4 + $0x28] sm:$0xff]  ;;  %v1832_v28 = vld [vmem:[#allocation4 + $0x38] sm:$0xff] }
  0x3c   :  { %1337 = vmatpush3.msra.mxu1 %v122_v10  ;;  %1294 = vmatprep.subr.mxu0 %v145_v11  ;;  %107 = vst [vmem:[#allocation2 + $0x3c] sm:$0xff] %v1827_v26  ;;  %v1830_v27 = vld [vmem:[#allocation4 + $0x30] sm:$0xff]  ;;  %v140_v29 = vld [vmem:[#allocation7 + $0x28] sm:$0xff]  ;;  %109 = vst [vmem:[#allocation2 + $0x54] sm:$0xff] %v1832_v28 }
  0x3d   :  { %1338 = vmatprep.subr.mxu1 %v121_v12  ;;  %1295 = vmatpush3.msra.mxu0 %v145_v11  ;;  %v116_v30 = vld [vmem:[#allocation7 + $0x128] sm:$0xff]  ;;  %108 = vst [vmem:[#allocation2 + $0x4c] sm:$0xff] %v1830_v27  ;;  %v139_v31 = vld [vmem:[#allocation7 + $0x20] sm:$0xff]  ;;  %v138_v33 = vld [vmem:[#allocation7 + $0x18] sm:$0xff] }
  0x3e   :  { %1339 = vmatpush3.msra.mxu1 %v121_v12  ;;  %1296 = vmatprep.subr.mxu0 %v144_v13  ;;  %v115_v32 = vld [vmem:[#allocation7 + $0x120] sm:$0xff]  ;;  %v114_v34 = vld [vmem:[#allocation7 + $0x118] sm:$0xff]  ;;  %v137_v35 = vld [vmem:[#allocation7 + $0x10] sm:$0xff] }
  0x3f   :  { %1340 = vmatprep.subr.mxu1 %v120_v14  ;;  %1297 = vmatpush3.msra.mxu0 %v144_v13  ;;  %v113_v36 = vld [vmem:[#allocation7 + $0x110] sm:$0xff]  ;;  %v136_v37 = vld [vmem:[#allocation7 + $0x8] sm:$0xff]  ;;  %v135_v39 = vld [vmem:[#allocation7] sm:$0xff] }
  0x40   :  { %1341 = vmatpush3.msra.mxu1 %v120_v14  ;;  %1298 = vmatprep.subr.mxu0 %v143_v17  ;;  %v112_v38 = vld [vmem:[#allocation7 + $0x108] sm:$0xff]  ;;  %v111_v40 = vld [vmem:[#allocation7 + $0x100] sm:$0xff]  ;;  %v385_v43 = vld [vmem:[#allocation7 + $0xf8] sm:$0xff] }
  0x41   :  { %1342 = vmatprep.subr.mxu1 %v119_v18  ;;  %1299 = vmatpush3.msra.mxu0 %v143_v17  ;;  %v127_v41 = vld [vmem:[#allocation2] sm:$0xff]  ;;  %v128_v42 = vld [vmem:[#allocation2 + $0x8] sm:$0xff]  ;;  %v129_v44 = vld [vmem:[#allocation2 + $0x18] sm:$0xff] }
  0x42   :  { %1343 = vmatpush3.msra.mxu1 %v119_v18  ;;  %1300 = vmatprep.subr.mxu0 %v142_v19  ;;  %v384_v45 = vld [vmem:[#allocation7 + $0xf0] sm:$0xff]  ;;  %v383_v46 = vld [vmem:[#allocation7 + $0xe8] sm:$0xff]  ;;  %v130_v47 = vld [vmem:[#allocation2 + $0x20] sm:$0xff] }
  0x43   :  { %1344 = vmatprep.subr.mxu1 %v118_v20  ;;  %1301 = vmatpush3.msra.mxu0 %v142_v19  ;;  %v131_v48 = vld [vmem:[#allocation2 + $0x30] sm:$0xff]  ;;  %v382_v49 = vld [vmem:[#allocation7 + $0xe0] sm:$0xff]  ;;  %v381_v50 = vld [vmem:[#allocation7 + $0xd8] sm:$0xff] }
  0x44   :  { %1345 = vmatpush3.msra.mxu1 %v118_v20  ;;  %1302 = vmatprep.subr.mxu0 %v141_v24  ;;  %v132_v51 = vld [vmem:[#allocation2 + $0x38] sm:$0xff]  ;;  %v133_v52 = vld [vmem:[#allocation2 + $0x48] sm:$0xff]  ;;  %v380_v53 = vld [vmem:[#allocation7 + $0xd0] sm:$0xff] }
  0x45   :  { %1346 = vmatprep.subr.mxu1 %v117_v25  ;;  %1303 = vmatpush3.msra.mxu0 %v141_v24  ;;  %v379_v54 = vld [vmem:[#allocation7 + $0xc8] sm:$0xff]  ;;  %v134_v55 = vld [vmem:[#allocation2 + $0x50] sm:$0xff]  ;;  %v378_v57 = vld [vmem:[#allocation7 + $0xc0] sm:$0xff] }
  0x46   :  { %1347 = vmatpush3.msra.mxu1 %v117_v25  ;;  %1304 = vmatprep.subr.mxu0 %v140_v29  ;;  %v361_v56 = vld [vmem:[#allocation2 + $0x2] sm:$0xff]  ;;  %v377_v58 = vld [vmem:[#allocation7 + $0xb8] sm:$0xff]  ;;  %v376_v59 = vld [vmem:[#allocation7 + $0xb0] sm:$0xff] }
  0x47   :  { %1348 = vmatprep.subr.mxu1 %v116_v30  ;;  %1305 = vmatpush3.msra.mxu0 %v140_v29  ;;  %v375_v60 = vld [vmem:[#allocation7 + $0xa8] sm:$0xff]  ;;  %v374_v61 = vld [vmem:[#allocation7 + $0xa0] sm:$0xff]  ;;  %v373_v62 = vld [vmem:[#allocation7 + $0x98] sm:$0xff] }
  0x48   :  { %1349 = vmatpush3.msra.mxu1 %v116_v30  ;;  %1306 = vmatprep.subr.mxu0 %v139_v31  ;;  %v372_v63 = vld [vmem:[#allocation7 + $0x90] sm:$0xff]  ;;  %v371_v0 = vld [vmem:[#allocation7 + $0x88] sm:$0xff]  ;;  %v370_v1 = vld [vmem:[#allocation7 + $0x80] sm:$0xff] }
  0x49   :  { %1350 = vmatprep.subr.mxu1 %v115_v32  ;;  %1307 = vmatpush3.msra.mxu0 %v139_v31  ;;  %v362_v2 = vld [vmem:[#allocation2 + $0xa] sm:$0xff]  ;;  %v363_v3 = vld [vmem:[#allocation2 + $0x1a] sm:$0xff]  ;;  %v364_v4 = vld [vmem:[#allocation2 + $0x22] sm:$0xff] }
  0x4a   :  { %1351 = vmatpush3.msra.mxu1 %v115_v32  ;;  %1308 = vmatprep.subr.mxu0 %v138_v33  ;;  %v365_v5 = vld [vmem:[#allocation2 + $0x32] sm:$0xff]  ;;  %v366_v6 = vld [vmem:[#allocation2 + $0x3a] sm:$0xff]  ;;  %v367_v7 = vld [vmem:[#allocation2 + $0x4a] sm:$0xff] }
  0x4b   :  { %1352 = vmatprep.subr.mxu1 %v114_v34  ;;  %1309 = vmatpush3.msra.mxu0 %v138_v33  ;;  %v368_v8 = vld [vmem:[#allocation2 + $0x52] sm:$0xff]  ;;  %v544_v12 = vld [vmem:[#allocation9 + $0x168] sm:$0xff]  ;;  %v543_v14 = vld [vmem:[#allocation9 + $0x160] sm:$0xff] }
  0x4c   :  { %1353 = vmatpush3.msra.mxu1 %v114_v34  ;;  %1310 = vmatprep.subr.mxu0 %v137_v35  ;;  %v546_v9 = vld [vmem:[#allocation9 + $0x178] sm:$0xff]  ;;  %v545_v10 = vld [vmem:[#allocation9 + $0x170] sm:$0xff]  ;;  %v568_v17 = vld [vmem:[#allocation9 + $0x68] sm:$0xff] }
  0x4d   :  { %1354 = vmatprep.subr.mxu1 %v113_v36  ;;  %1311 = vmatpush3.msra.mxu0 %v137_v35  ;;  %v570_v11 = vld [vmem:[#allocation9 + $0x78] sm:$0xff]  ;;  %v569_v13 = vld [vmem:[#allocation9 + $0x70] sm:$0xff]  ;;  %v567_v19 = vld [vmem:[#allocation9 + $0x60] sm:$0xff] }
  0x4e   :  { %1355 = vmatpush3.msra.mxu1 %v113_v36  ;;  %1312 = vmatprep.subr.mxu0 %v136_v37  ;;  %v542_v18 = vld [vmem:[#allocation9 + $0x158] sm:$0xff]  ;;  %v541_v20 = vld [vmem:[#allocation9 + $0x150] sm:$0xff]  ;;  %v540_v25 = vld [vmem:[#allocation9 + $0x148] sm:$0xff] }
  0x4f   :  { %1356 = vmatprep.subr.mxu1 %v112_v38  ;;  %1313 = vmatpush3.msra.mxu0 %v136_v37  ;;  %v566_v24 = vld [vmem:[#allocation9 + $0x58] sm:$0xff]  ;;  %v565_v29 = vld [vmem:[#allocation9 + $0x50] sm:$0xff]  ;;  %v539_v30 = vld [vmem:[#allocation9 + $0x140] sm:$0xff] }
  0x50   :  { %1357 = vmatpush3.msra.mxu1 %v112_v38  ;;  %1314 = vmatprep.subr.mxu0 %v135_v39  ;;  %v564_v31 = vld [vmem:[#allocation9 + $0x48] sm:$0xff]  ;;  %v538_v32 = vld [vmem:[#allocation9 + $0x138] sm:$0xff]  ;;  %v563_v33 = vld [vmem:[#allocation9 + $0x40] sm:$0xff] }
  0x51   :  { %1358 = vmatprep.subr.mxu1 %v111_v40  ;;  %1315 = vmatpush3.msra.mxu0 %v135_v39  ;;  %v537_v34 = vld [vmem:[#allocation9 + $0x130] sm:$0xff]  ;;  %v536_v35 = vld [vmem:[#allocation9 + $0x128] sm:$0xff]  ;;  %v535_v36 = vld [vmem:[#allocation9 + $0x120] sm:$0xff] }
  0x52   :  { %1316 = vmatprep.mubr.f32.mxu0 %v127_v41  ;;  %1359 = vmatpush3.msra.mxu1 %v111_v40  ;;  %v562_v37 = vld [vmem:[#allocation9 + $0x38] sm:$0xff]  ;;  %v561_v39 = vld [vmem:[#allocation9 + $0x30] sm:$0xff]  ;;  %v560_v41 = vld [vmem:[#allocation9 + $0x28] sm:$0xff] }
  0x53   :  { %1360 = vmatprep.mubr.f32.mxu1 %v1812_v15  ;;  %1317 = vmatmul.mubr.f32.vlgmr.msra.gmra.mxu0 %v128_v42  ;;  %v534_v38 = vld [vmem:[#allocation9 + $0x118] sm:$0xff]  ;;  %v533_v40 = vld [vmem:[#allocation9 + $0x110] sm:$0xff]  ;;  %v532_v42 = vld [vmem:[#allocation9 + $0x108] sm:$0xff] }
  0x54   :  { %1361 = vmatmul.mubr.f32.vlgmr.msra.gmra.mxu1 %v1815_v16  ;;  %1372 = vmatprep.subr.mxu0 %v385_v43 }
  0x55   :  { %1319 = vmatprep.mubr.f32.mxu0 %v129_v44  ;;  %1373 = vmatpush3.msra.mxu0 %v385_v43  ;;  %v559_v43 = vld [vmem:[#allocation9 + $0x20] sm:$0xff] }
  0x56   :  { %1363 = vmatprep.mubr.f32.mxu1 %v1818_v21  ;;  %1374 = vmatprep.subr.mxu0 %v384_v45  ;;  %v531_v44 = vld [vmem:[#allocation9 + $0x100] sm:$0xff] }
  0x57   :  { %1375 = vmatpush3.msra.mxu0 %v384_v45  ;;  %1416 = vmatprep.subr.mxu1 %v570_v11  ;;  %v558_v45 = vld [vmem:[#allocation9 + $0x18] sm:$0xff] }
  0x58   :  { %1364 = vmatmul.mubr.f32.gmra.mxu1 %v1820_v22  ;;  %1376 = vmatprep.subr.mxu0 %v383_v46 }
  0x59   :  { %1320 = vmatmul.mubr.f32.gmra.mxu0 %v130_v47  ;;  %1366 = vmatprep.mubr.f32.mxu1 %v1824_v23  ;;  %v556_v47 = vld [vmem:[#allocation9 + $0x8] sm:$0xff] }
  0x5a   :  { %1377 = vmatpush3.msra.mxu0 %v383_v46  ;;  %1322 = vmatprep.mubr.f32.mxu0 %v131_v48  ;;  %v557_v46 = vld [vmem:[#allocation9 + $0x10] sm:$0xff]  ;;  %v555_v48 = vld [vmem:[#allocation9] sm:$0xff] }
  0x5b   :  { %1378 = vmatprep.subr.mxu0 %v382_v49  ;;  %1417 = vmatpush3.msra.mxu1 %v570_v11 }
  0x5c   :  { %1379 = vmatpush3.msra.mxu0 %v382_v49  ;;  %1367 = vmatmul.mubr.f32.gmra.mxu1 %v1827_v26  ;;  %v1844_v49 = vld [vmem:[#allocation9 + $0xf8] sm:$0xff] }
  0x5d   :  { %1380 = vmatprep.subr.mxu0 %v381_v50  ;;  %1323 = vmatmul.mubr.f32.gmra.mxu0 %v132_v51 }
  0x5e   :  { %1381 = vmatpush3.msra.mxu0 %v381_v50  ;;  %1325 = vmatprep.mubr.f32.mxu0 %v133_v52  ;;  %v1847_v50 = vld [vmem:[#allocation10 + $0x78] sm:$0xff] }
  0x5f   :  { %1382 = vmatprep.subr.mxu0 %v380_v53  ;;  %1369 = vmatprep.mubr.f32.mxu1 %v1830_v27 }
  0x60   :  { %1383 = vmatpush3.msra.mxu0 %v380_v53  ;;  %1370 = vmatmul.mubr.f32.gmra.mxu1 %v1832_v28 }
  0x61   :  { %1384 = vmatprep.subr.mxu0 %v379_v54  ;;  %1326 = vmatmul.mubr.f32.gmra.mxu0 %v134_v55 }
  0x62   :  { %1385 = vmatpush3.msra.mxu0 %v379_v54  ;;  %1404 = vmatprep.mubr.f32.mxu0 %v361_v56 }
  0x63   :  { %1386 = vmatprep.subr.mxu0 %v378_v57  ;;  %1418 = vmatprep.subr.mxu1 %v569_v13 }
  0x64   :  { %1387 = vmatpush3.msra.mxu0 %v378_v57  ;;  %1419 = vmatpush3.msra.mxu1 %v569_v13 }
  0x65   :  { %1388 = vmatprep.subr.mxu0 %v377_v58  ;;  %1420 = vmatprep.subr.mxu1 %v568_v17 }
  0x66   :  { %1389 = vmatpush3.msra.mxu0 %v377_v58  ;;  %1421 = vmatpush3.msra.mxu1 %v568_v17 }
  0x67   :  { %1390 = vmatprep.subr.mxu0 %v376_v59  ;;  %1422 = vmatprep.subr.mxu1 %v567_v19 }
  0x68   :  { %1391 = vmatpush3.msra.mxu0 %v376_v59  ;;  %1423 = vmatpush3.msra.mxu1 %v567_v19 }
  0x69   :  { %1392 = vmatprep.subr.mxu0 %v375_v60  ;;  %1424 = vmatprep.subr.mxu1 %v566_v24 }
  0x6a   :  { %1393 = vmatpush3.msra.mxu0 %v375_v60  ;;  %1425 = vmatpush3.msra.mxu1 %v566_v24 }
  0x6b   :  { %1394 = vmatprep.subr.mxu0 %v374_v61  ;;  %1426 = vmatprep.subr.mxu1 %v565_v29 }
  0x6c   :  { %1395 = vmatpush3.msra.mxu0 %v374_v61  ;;  %1427 = vmatpush3.msra.mxu1 %v565_v29 }
  0x6d   :  { %1396 = vmatprep.subr.mxu0 %v373_v62  ;;  %1428 = vmatprep.subr.mxu1 %v564_v31 }
  0x6e   :  { %1397 = vmatpush3.msra.mxu0 %v373_v62  ;;  %1429 = vmatpush3.msra.mxu1 %v564_v31 }
  0x6f   :  { %1398 = vmatprep.subr.mxu0 %v372_v63  ;;  %1430 = vmatprep.subr.mxu1 %v563_v33 }
  0x70   :  { %1399 = vmatpush3.msra.mxu0 %v372_v63  ;;  %1431 = vmatpush3.msra.mxu1 %v563_v33 }
  0x71   :  { %1400 = vmatprep.subr.mxu0 %v371_v0  ;;  %1432 = vmatprep.subr.mxu1 %v562_v37 }
  0x72   :  { %1401 = vmatpush3.msra.mxu0 %v371_v0  ;;  %1433 = vmatpush3.msra.mxu1 %v562_v37 }
  0x73   :  { %1402 = vmatprep.subr.mxu0 %v370_v1  ;;  %1434 = vmatprep.subr.mxu1 %v561_v39 }
  0x74   :  { %1403 = vmatpush3.msra.mxu0 %v370_v1  ;;  %1435 = vmatpush3.msra.mxu1 %v561_v39 }
  0x75   :  { %1405 = vmatmul.mubr.f32.vlgmr.msra.gmra.mxu0 %v362_v2  ;;  %1460 = vmatprep.subr.mxu0 %v546_v9  ;;  %v1113_v2 = vld [vmem:[%s1967_s2] ss:$0 sm:$0xff] }
  0x76   :  { %1407 = vmatprep.mubr.f32.mxu0 %v363_v3  ;;  %1461 = vmatpush3.msra.mxu0 %v546_v9 }
  0x77   :  { %1462 = vmatprep.subr.mxu0 %v545_v10  ;;  %1436 = vmatprep.subr.mxu1 %v560_v41 }
  0x78   :  { %1463 = vmatpush3.msra.mxu0 %v545_v10  ;;  %1437 = vmatpush3.msra.mxu1 %v560_v41  ;;  %v1856_v41 = vld [vmem:[#allocation10 + $0x68] sm:$0xff] }
  0x79   :  { %1408 = vmatmul.mubr.f32.gmra.mxu0 %v364_v4  ;;  %1464 = vmatprep.subr.mxu0 %v544_v12 }
  0x7a   :  { %1410 = vmatprep.mubr.f32.mxu0 %v365_v5  ;;  %1465 = vmatpush3.msra.mxu0 %v544_v12 }
  0x7b   :  { %1466 = vmatprep.subr.mxu0 %v543_v14  ;;  %1438 = vmatprep.subr.mxu1 %v559_v43 }
  0x7c   :  { %1467 = vmatpush3.msra.mxu0 %v543_v14  ;;  %1439 = vmatpush3.msra.mxu1 %v559_v43 }
  0x7d   :  { %1411 = vmatmul.mubr.f32.gmra.mxu0 %v366_v6  ;;  %1468 = vmatprep.subr.mxu0 %v542_v18 }
  0x7e   :  { %1413 = vmatprep.mubr.f32.mxu0 %v367_v7  ;;  %1469 = vmatpush3.msra.mxu0 %v542_v18 }
  0x7f   :  { %1470 = vmatprep.subr.mxu0 %v541_v20  ;;  %1440 = vmatprep.subr.mxu1 %v558_v45 }
  0x80   :  { %1471 = vmatpush3.msra.mxu0 %v541_v20  ;;  %1441 = vmatpush3.msra.mxu1 %v558_v45 }
  0x81   :  { %1414 = vmatmul.mubr.f32.gmra.mxu0 %v368_v8  ;;  %1472 = vmatprep.subr.mxu0 %v540_v25 }
  0x82   :  { %1473 = vmatpush3.msra.mxu0 %v540_v25  ;;  %1442 = vmatprep.subr.mxu1 %v557_v46 }
  0x83   :  { %1474 = vmatprep.subr.mxu0 %v539_v30  ;;  %1443 = vmatpush3.msra.mxu1 %v557_v46 }
  0x84   :  { %1475 = vmatpush3.msra.mxu0 %v539_v30  ;;  %1444 = vmatprep.subr.mxu1 %v556_v47 }
  0x85   :  { %1476 = vmatprep.subr.mxu0 %v538_v32  ;;  %1445 = vmatpush3.msra.mxu1 %v556_v47  ;;  %v1860_v47 = vld [vmem:[#allocation10 + $0x60] sm:$0xff] }
  0x86   :  { %1477 = vmatpush3.msra.mxu0 %v538_v32  ;;  %1446 = vmatprep.subr.mxu1 %v555_v48 }
  0x87   :  { %1478 = vmatprep.subr.mxu0 %v537_v34  ;;  %1447 = vmatpush3.msra.mxu1 %v555_v48 }
  0x88   :  { %1479 = vmatpush3.msra.mxu0 %v537_v34  ;;  %1504 = vmatprep.subr.mxu1 %v1844_v49  ;;  %v1853_v34 = vld [vmem:[#allocation10 + $0x70] sm:$0xff] }
  0x89   :  { %1480 = vmatprep.subr.mxu0 %v536_v35 }
  0x8a   :  { %1481 = vmatpush3.msra.mxu0 %v536_v35 }
  0x8b   :  { %1482 = vmatprep.subr.mxu0 %v535_v36 }
  0x8c   :  { %1483 = vmatpush3.msra.mxu0 %v535_v36 }
  0x8d   :  { %1484 = vmatprep.subr.mxu0 %v534_v38 }
  0x8e   :  { %1485 = vmatpush3.msra.mxu0 %v534_v38 }
  0x8f   :  { %1486 = vmatprep.subr.mxu0 %v533_v40 }
  0x90   :  { %1487 = vmatpush3.msra.mxu0 %v533_v40 }
  0x91   :  { %1488 = vmatprep.subr.mxu0 %v532_v42 }
  0x92   :  { %1489 = vmatpush3.msra.mxu0 %v532_v42 }
  0x93   :  { %1490 = vmatprep.subr.mxu0 %v531_v44 }
  0x94   :  { %1491 = vmatpush3.msra.mxu0 %v531_v44 }
  0x95   :  { %1548 = vmatprep.subr.mxu0 %v1847_v50 }
 0x113   :  { %v1318_v51 = vpop.f32.mrf.mxu0 }
 0x114   :  { %v1362_v55 = vpop.f32.mrf.mxu1 }
 0x115   :  { %v217_v52 = vpop.f32.mrf.mxu0  ;;  %v328_v0 = vadd.f32 %v1362_v55, %v1318_v51 }
 0x116   :  { %v322_v57 = vpop.f32.mrf.mxu1 }
 0x117   :  { %v323_v3 = vadd.f32 %v322_v57, %v217_v52 }
 0x118   :  { %v1365_v58 = vpop.f32.mrf.mxu1 }
 0x119   :  { %v1321_v53 = vpop.f32.mrf.mxu0 }
 0x11a   :  { %v332_v60 = vpop.f32.mrf.mxu1  ;;  %v338_v7 = vadd.f32 %v1365_v58, %v1321_v53  ;;  %v804_v58 = vld [vmem:[#allocation9 + $0xf0] sm:$0xff] }
 0x11b   :  { %v227_v54 = vpop.f32.mrf.mxu0 }
 0x11c   :  { %v1368_v62 = vpop.f32.mrf.mxu1  ;;  %v333_v11 = vadd.f32 %v332_v60, %v227_v54 }
 0x11d   :  { %v1324_v56 = vpop.f32.mrf.mxu0 }
 0x11e   :  { %v342_v5 = vpop.f32.mrf.mxu1  ;;  %v348_v19 = vadd.f32 %v1368_v62, %v1324_v56 }
 0x11f   :  { %v237_v59 = vpop.f32.mrf.mxu0 }
 0x120   :  { %v1371_v17 = vpop.f32.mrf.mxu1  ;;  %v343_v30 = vadd.f32 %v342_v5, %v237_v59  ;;  %v1865_v59 = vld [vmem:[#allocation10 + $0x58] sm:$0xff]  ;;  %v1874_v5 = vld [vmem:[#allocation10 + $0x48] sm:$0xff] }
 0x121   :  { %v1327_v61 = vpop.f32.mrf.mxu0 }
 0x122   :  { %v352_v35 = vpop.f32.mrf.mxu1  ;;  %v358_v37 = vadd.f32 %v1371_v17, %v1327_v61  ;;  %v803_v61 = vld [vmem:[#allocation9 + $0xe8] sm:$0xff]  ;;  %v1885_v17 = vld [vmem:[#allocation10 + $0x30] sm:$0xff] }
 0x123   :  { %v247_v63 = vpop.f32.mrf.mxu0 }
 0x124   :  { %v353_v43 = vadd.f32 %v352_v35, %v247_v63  ;;  %v790_v35 = vld [vmem:[#allocation9 + $0x80] sm:$0xff] }
 0x135   :  { %v1406_v1 = vpop.f32.mrf.mxu0 }
 0x136   :  { %v492_v4 = vadd.f32 %v1406_v1, %v328_v0  ;;  %v802_v0 = vld [vmem:[#allocation9 + $0xe0] sm:$0xff]  ;;  %v1870_v1 = vld [vmem:[#allocation10 + $0x50] sm:$0xff] }
 0x137   :  { %v452_v6 = vpop.f32.mrf.mxu0 }
 0x138   :  { %v507_v8 = vadd.f32 %v1113_v2, %v492_v4  ;;  %v491_v9 = vadd.f32 %v452_v6, %v323_v3  ;;  %v800_v4 = vld [vmem:[#allocation9 + $0xd0] sm:$0xff] }
 0x139   :  { %v1409_v10 = vpop.f32.mrf.mxu0 }
 0x13a   :  { %v515_v12 = vmax.f32 %v507_v8, 0.0  ;;  %v506_v13 = vadd.f32 %v1113_v2, %v491_v9  ;;  %v494_v14 = vadd.f32 %v1409_v10, %v338_v7  ;;  %v799_v7 = vld [vmem:[#allocation9 + $0xc8] sm:$0xff]  ;;  %v798_v9 = vld [vmem:[#allocation9 + $0xc0] sm:$0xff] }
 0x13b   :  { %v462_v18 = vpop.f32.mrf.mxu0 }
 0x13c   :  { %523 = vst [vmem:[#allocation3 + $0xc] sm:$0xff] %v515_v12  ;;  %v514_v20 = vmax.f32 %v506_v13, 0.0  ;;  %v509_v24 = vadd.f32 %v1113_v2, %v494_v14  ;;  %v493_v25 = vadd.f32 %v462_v18, %v333_v11  ;;  %v1878_v11 = vld [vmem:[#allocation10 + $0x40] sm:$0xff]  ;;  %v1881_v13 = vld [vmem:[#allocation10 + $0x38] sm:$0xff]  ;;  %v796_v14 = vld [vmem:[#allocation9 + $0xb0] sm:$0xff] }
 0x13d   :  { %v1412_v29 = vpop.f32.mrf.mxu0  ;;  %v795_v18 = vld [vmem:[#allocation9 + $0xa8] sm:$0xff] }
 0x13e   :  { %522 = vst [vmem:[#allocation3 + $0x4] sm:$0xff] %v514_v20  ;;  %v517_v31 = vmax.f32 %v509_v24, 0.0  ;;  %v508_v32 = vadd.f32 %v1113_v2, %v493_v25  ;;  %v496_v33 = vadd.f32 %v1412_v29, %v348_v19  ;;  %1492 = vmatprep.mubr.f32.mxu0 %v514_v20  ;;  %v1889_v19 = vld [vmem:[#allocation10 + $0x28] sm:$0xff]  ;;  %v794_v20 = vld [vmem:[#allocation9 + $0xa0] sm:$0xff]  ;;  %v793_v25 = vld [vmem:[#allocation9 + $0x98] sm:$0xff] }
 0x13f   :  { %v472_v36 = vpop.f32.mrf.mxu0  ;;  %1493 = vmatmul.mubr.f32.vlgmr.msra.gmra.mxu0 %v515_v12  ;;  %v797_v12 = vld [vmem:[#allocation9 + $0xb8] sm:$0xff]  ;;  %v1893_v24 = vld [vmem:[#allocation10 + $0x20] sm:$0xff] }
 0x140   :  { %525 = vst [vmem:[#allocation3 + $0x24] sm:$0xff] %v517_v31  ;;  %v516_v38 = vmax.f32 %v508_v32, 0.0  ;;  %v511_v39 = vadd.f32 %v1113_v2, %v496_v33  ;;  %v495_v40 = vadd.f32 %v472_v36, %v343_v30  ;;  %1549 = vmatpush3.msra.mxu0 %v1847_v50  ;;  %v1897_v29 = vld [vmem:[#allocation10 + $0x18] sm:$0xff]  ;;  %v792_v30 = vld [vmem:[#allocation9 + $0x90] sm:$0xff]  ;;  %v791_v32 = vld [vmem:[#allocation9 + $0x88] sm:$0xff] }
 0x141   :  { %v1415_v42 = vpop.f32.mrf.mxu0  ;;  %1550 = vmatprep.subr.mxu0 %v1853_v34  ;;  %v943_v33 = vld [vmem:[#allocation10 + $0x8] sm:$0xff]  ;;  %v942_v36 = vld [vmem:[#allocation10] sm:$0xff] }
 0x142   :  { %524 = vst [vmem:[#allocation3 + $0x1c] sm:$0xff] %v516_v38  ;;  %v519_v44 = vmax.f32 %v511_v39, 0.0  ;;  %v510_v45 = vadd.f32 %v1113_v2, %v495_v40  ;;  %v498_v46 = vadd.f32 %v1415_v42, %v358_v37  ;;  %1495 = vmatprep.mubr.f32.mxu0 %v516_v38  ;;  %1551 = vmatpush3.msra.mxu0 %v1853_v34 }
 0x143   :  { %v482_v48 = vpop.f32.mrf.mxu0  ;;  %1496 = vmatmul.mubr.f32.gmra.mxu0 %v517_v31  ;;  %1552 = vmatprep.subr.mxu0 %v1856_v41  ;;  %v1901_v31 = vld [vmem:[#allocation10 + $0x10] sm:$0xff] }
 0x144   :  { %527 = vst [vmem:[#allocation3 + $0x3c] sm:$0xff] %v519_v44  ;;  %v518_v51 = vmax.f32 %v510_v45, 0.0  ;;  %v513_v52 = vadd.f32 %v1113_v2, %v498_v46  ;;  %v497_v53 = vadd.f32 %v482_v48, %v353_v43  ;;  %1553 = vmatpush3.msra.mxu0 %v1856_v41 }
 0x145   :  { %v547_v54 = vld [vmem:[#allocation3] sm:$0xff]  ;;  %v548_v55 = vld [vmem:[#allocation3 + $0x8] sm:$0xff]  ;;  %1554 = vmatprep.subr.mxu0 %v1860_v47 }
 0x146   :  { %526 = vst [vmem:[#allocation3 + $0x34] sm:$0xff] %v518_v51  ;;  %v521_v56 = vmax.f32 %v513_v52, 0.0  ;;  %v512_v57 = vadd.f32 %v1113_v2, %v497_v53  ;;  %1448 = vmatprep.mubr.f32.mxu1 %v547_v54  ;;  %1498 = vmatprep.mubr.f32.mxu0 %v518_v51  ;;  %v801_v2 = vld [vmem:[#allocation9 + $0xd8] sm:$0xff]  ;;  %v781_v10 = vld [vmem:[#allocation3 + $0x2] sm:$0xff]  ;;  %v782_v37 = vld [vmem:[#allocation3 + $0xa] sm:$0xff] }
 0x147   :  { %1449 = vmatmul.mubr.f32.vlgmr.msra.gmra.mxu1 %v548_v55  ;;  %1499 = vmatmul.mubr.f32.gmra.mxu0 %v519_v44 }
 0x148   :  { %529 = vst [vmem:[#allocation3 + $0x54] sm:$0xff] %v521_v56  ;;  %v520_v60 = vmax.f32 %v512_v57, 0.0  ;;  %1505 = vmatpush3.msra.mxu1 %v1844_v49  ;;  %1555 = vmatpush3.msra.mxu0 %v1860_v47 }
 0x149   :  { %1506 = vmatprep.subr.mxu1 %v804_v58  ;;  %v549_v62 = vld [vmem:[#allocation3 + $0x18] sm:$0xff]  ;;  %v550_v63 = vld [vmem:[#allocation3 + $0x20] sm:$0xff]  ;;  %1556 = vmatprep.subr.mxu0 %v1865_v59 }
 0x14a   :  { %528 = vst [vmem:[#allocation3 + $0x4c] sm:$0xff] %v520_v60  ;;  %1507 = vmatpush3.msra.mxu1 %v804_v58  ;;  %1451 = vmatprep.mubr.f32.mxu1 %v549_v62  ;;  %v783_v38 = vld [vmem:[#allocation3 + $0x1a] sm:$0xff]  ;;  %v784_v39 = vld [vmem:[#allocation3 + $0x22] sm:$0xff] }
 0x14b   :  { %1501 = vmatprep.mubr.f32.mxu0 %v520_v60  ;;  %1508 = vmatprep.subr.mxu1 %v803_v61 }
 0x14c   :  { %1452 = vmatmul.mubr.f32.gmra.mxu1 %v550_v63  ;;  %1502 = vmatmul.mubr.f32.gmra.mxu0 %v521_v56 }
 0x14d   :  { %1509 = vmatpush3.msra.mxu1 %v803_v61  ;;  %v551_v49 = vld [vmem:[#allocation3 + $0x30] sm:$0xff]  ;;  %v552_v3 = vld [vmem:[#allocation3 + $0x38] sm:$0xff]  ;;  %1557 = vmatpush3.msra.mxu0 %v1865_v59  ;;  %v1949_v61 = vld [vmem:[%s1971_s6] ss:$0 sm:$0xff] }
 0x14e   :  { %1510 = vmatprep.subr.mxu1 %v802_v0  ;;  %1454 = vmatprep.mubr.f32.mxu1 %v551_v49  ;;  %v785_v40 = vld [vmem:[#allocation3 + $0x32] sm:$0xff] }
 0x14f   :  { %1511 = vmatpush3.msra.mxu1 %v802_v0  ;;  %1558 = vmatprep.subr.mxu0 %v1870_v1 }
 0x150   :  { %1512 = vmatprep.subr.mxu1 %v801_v2  ;;  %1455 = vmatmul.mubr.f32.gmra.mxu1 %v552_v3 }
 0x151   :  { %1513 = vmatpush3.msra.mxu1 %v801_v2  ;;  %v553_v6 = vld [vmem:[#allocation3 + $0x48] sm:$0xff]  ;;  %v554_v8 = vld [vmem:[#allocation3 + $0x50] sm:$0xff]  ;;  %1559 = vmatpush3.msra.mxu0 %v1870_v1 }
 0x152   :  { %1514 = vmatprep.subr.mxu1 %v800_v4  ;;  %1457 = vmatprep.mubr.f32.mxu1 %v553_v6 }
 0x153   :  { %1515 = vmatpush3.msra.mxu1 %v800_v4  ;;  %1560 = vmatprep.subr.mxu0 %v1874_v5 }
 0x154   :  { %1516 = vmatprep.subr.mxu1 %v799_v7  ;;  %1458 = vmatmul.mubr.f32.gmra.mxu1 %v554_v8 }
 0x155   :  { %1517 = vmatpush3.msra.mxu1 %v799_v7  ;;  %1536 = vmatprep.mubr.f32.mxu1 %v781_v10 }
 0x156   :  { %1518 = vmatprep.subr.mxu1 %v798_v9  ;;  %1561 = vmatpush3.msra.mxu0 %v1874_v5 }
 0x157   :  { %1519 = vmatpush3.msra.mxu1 %v798_v9  ;;  %1562 = vmatprep.subr.mxu0 %v1878_v11 }
 0x158   :  { %1520 = vmatprep.subr.mxu1 %v797_v12  ;;  %1563 = vmatpush3.msra.mxu0 %v1878_v11 }
 0x159   :  { %1521 = vmatpush3.msra.mxu1 %v797_v12  ;;  %1564 = vmatprep.subr.mxu0 %v1881_v13 }
 0x15a   :  { %1522 = vmatprep.subr.mxu1 %v796_v14  ;;  %1565 = vmatpush3.msra.mxu0 %v1881_v13 }
 0x15b   :  { %1523 = vmatpush3.msra.mxu1 %v796_v14  ;;  %1566 = vmatprep.subr.mxu0 %v1885_v17 }
 0x15c   :  { %1524 = vmatprep.subr.mxu1 %v795_v18  ;;  %1567 = vmatpush3.msra.mxu0 %v1885_v17 }
 0x15d   :  { %1525 = vmatpush3.msra.mxu1 %v795_v18  ;;  %1568 = vmatprep.subr.mxu0 %v1889_v19 }
 0x15e   :  { %1526 = vmatprep.subr.mxu1 %v794_v20  ;;  %1569 = vmatpush3.msra.mxu0 %v1889_v19 }
 0x15f   :  { %1527 = vmatpush3.msra.mxu1 %v794_v20  ;;  %1570 = vmatprep.subr.mxu0 %v1893_v24 }
 0x160   :  { %1528 = vmatprep.subr.mxu1 %v793_v25  ;;  %1571 = vmatpush3.msra.mxu0 %v1893_v24 }
 0x161   :  { %1529 = vmatpush3.msra.mxu1 %v793_v25  ;;  %1572 = vmatprep.subr.mxu0 %v1897_v29 }
 0x162   :  { %1530 = vmatprep.subr.mxu1 %v792_v30  ;;  %1573 = vmatpush3.msra.mxu0 %v1897_v29 }
 0x163   :  { %1531 = vmatpush3.msra.mxu1 %v792_v30  ;;  %1574 = vmatprep.subr.mxu0 %v1901_v31 }
 0x164   :  { %1532 = vmatprep.subr.mxu1 %v791_v32  ;;  %1575 = vmatpush3.msra.mxu0 %v1901_v31 }
 0x165   :  { %1533 = vmatpush3.msra.mxu1 %v791_v32  ;;  %1576 = vmatprep.subr.mxu0 %v943_v33 }
 0x166   :  { %1534 = vmatprep.subr.mxu1 %v790_v35  ;;  %1577 = vmatpush3.msra.mxu0 %v943_v33 }
 0x167   :  { %1535 = vmatpush3.msra.mxu1 %v790_v35  ;;  %1578 = vmatprep.subr.mxu0 %v942_v36 }
 0x168   :  { %1537 = vmatmul.mubr.f32.vlgmr.msra.gmra.mxu1 %v782_v37  ;;  %1592 = vmatprep.subr.mxu1 %v1847_v50 }
 0x169   :  { %1539 = vmatprep.mubr.f32.mxu1 %v783_v38  ;;  %1608 = vmatpush3.msra.mxu1 %v1847_v50  ;;  %v786_v50 = vld [vmem:[#allocation3 + $0x3a] sm:$0xff] }
 0x16a   :  { %1593 = vmatprep.subr.mxu1 %v1853_v34  ;;  %1579 = vmatpush3.msra.mxu0 %v942_v36 }
 0x16b   :  { %1609 = vmatpush3.msra.mxu1 %v1853_v34  ;;  %1580 = vmatprep.mubr.f32.mxu0 %v1812_v15  ;;  %v787_v15 = vld [vmem:[#allocation3 + $0x4a] sm:$0xff] }
 0x16c   :  { %1540 = vmatmul.mubr.f32.gmra.mxu1 %v784_v39  ;;  %1594 = vmatprep.subr.mxu1 %v1856_v41 }
 0x16d   :  { %1581 = vmatmul.mubr.f32.vlgmr.msra.gmra.mxu0 %v1815_v16  ;;  %1542 = vmatprep.mubr.f32.mxu1 %v785_v40  ;;  %v788_v16 = vld [vmem:[#allocation3 + $0x52] sm:$0xff] }
 0x16e   :  { %1610 = vmatpush3.msra.mxu1 %v1856_v41  ;;  %1583 = vmatprep.mubr.f32.mxu0 %v1818_v21 }
 0x16f   :  { %1595 = vmatprep.subr.mxu1 %v1860_v47 }
 0x170   :  { %1611 = vmatpush3.msra.mxu1 %v1860_v47 }
 0x171   :  { %1543 = vmatmul.mubr.f32.gmra.mxu1 %v786_v50  ;;  %1596 = vmatprep.subr.mxu1 %v1865_v59 }
 0x172   :  { %1584 = vmatmul.mubr.f32.gmra.mxu0 %v1820_v22  ;;  %1545 = vmatprep.mubr.f32.mxu1 %v787_v15 }
 0x173   :  { %1612 = vmatpush3.msra.mxu1 %v1865_v59 }
 0x174   :  { %1597 = vmatprep.subr.mxu1 %v1870_v1 }
 0x175   :  { %1613 = vmatpush3.msra.mxu1 %v1870_v1 }
 0x176   :  { %1546 = vmatmul.mubr.f32.gmra.mxu1 %v788_v16  ;;  %1598 = vmatprep.subr.mxu1 %v1874_v5 }
 0x177   :  { %1614 = vmatpush3.msra.mxu1 %v1874_v5  ;;  %1586 = vmatprep.mubr.f32.mxu1 %v1824_v23 }
 0x178   :  { %1599 = vmatprep.subr.mxu1 %v1878_v11 }
 0x179   :  { %1615 = vmatpush3.msra.mxu1 %v1878_v11 }
 0x17a   :  { %1600 = vmatprep.subr.mxu1 %v1881_v13 }
 0x17b   :  { %1616 = vmatpush3.msra.mxu1 %v1881_v13 }
 0x17c   :  { %1601 = vmatprep.subr.mxu1 %v1885_v17 }
 0x17d   :  { %1617 = vmatpush3.msra.mxu1 %v1885_v17 }
 0x17e   :  { %1602 = vmatprep.subr.mxu1 %v1889_v19 }
 0x17f   :  { %1618 = vmatpush3.msra.mxu1 %v1889_v19 }
 0x180   :  { %1603 = vmatprep.subr.mxu1 %v1893_v24 }
 0x181   :  { %1619 = vmatpush3.msra.mxu1 %v1893_v24 }
 0x182   :  { %1604 = vmatprep.subr.mxu1 %v1897_v29 }
 0x183   :  { %1620 = vmatpush3.msra.mxu1 %v1897_v29 }
 0x184   :  { %1605 = vmatprep.subr.mxu1 %v1901_v31 }
 0x185   :  { %1621 = vmatpush3.msra.mxu1 %v1901_v31 }
 0x186   :  { %1606 = vmatprep.subr.mxu1 %v943_v33 }
 0x187   :  { %1622 = vmatpush3.msra.mxu1 %v943_v33 }
 0x188   :  { %1607 = vmatprep.subr.mxu1 %v942_v36 }
 0x189   :  { %1623 = vmatpush3.msra.mxu1 %v942_v36 }
 0x18a   :  { %1587 = vmatmul.mubr.f32.vlgmr.msra.gmra.mxu1 %v1827_v26 }
 0x18b   :  { %1589 = vmatprep.mubr.f32.mxu1 %v1830_v27  ;;  %v1114_v27 = vld [vmem:[%s1969_s4] ss:$0 sm:$0xff]  ;;  %s1747_s4 = smov [#allocation12]  }
 0x18c   :  { %s1099_s6 = sshll.u32 %s1747_s4, 4  ;;  %s1100_s6 = int_to_ptr.vmem [resolvable:$true] %s1099_s6 }
 0x18d   :  { %s1712_s24 = scalar_lea.vmem %s1100_s6, 1024  ;;  %p1717_p7 = scmp.lt.s32.totalorder %s1100_s6, %s1100_s6 }
 0x18e   :  { %1590 = vmatmul.mubr.f32.gmra.mxu1 %v1832_v28  ;;  %p1713_p6 = scmp.ne.s32.totalorder %s1100_s6, %s1712_s24  ;;  %p1718_p8 = scmp.lt.s32.totalorder %s1712_s24, %s1712_s24 }
 0x190   :  { %p1719_p9 = por %p1718_p8, %p1717_p7 }
 0x192   :  { %p1720_p10 = pnand %p1719_p9, %p1713_p6 }
 0x1ff   :  { %v1494_v23 = vpop.f32.mrf.mxu0 }
 0x201   :  { %v742_v41 = vpop.f32.mrf.mxu0 }
 0x203   :  { %v1497_v43 = vpop.f32.mrf.mxu0 }
 0x205   :  { %v752_v45 = vpop.f32.mrf.mxu0 }
 0x207   :  { %v1450_v21 = vpop.f32.mrf.mxu1  ;;  %v1500_v47 = vpop.f32.mrf.mxu0 }
 0x208   :  { %v748_v53 = vadd.f32 %v1494_v23, %v1450_v21 }
 0x209   :  { %v637_v22 = vpop.f32.mrf.mxu1  ;;  %v762_v51 = vpop.f32.mrf.mxu0 }
 0x20a   :  { %v743_v28 = vadd.f32 %v742_v41, %v637_v22 }
 0x20c   :  { %v1453_v34 = vpop.f32.mrf.mxu1  ;;  %v1503_v26 = vpop.f32.mrf.mxu0 }
 0x20d   :  { %v758_v57 = vadd.f32 %v1497_v43, %v1453_v34 }
 0x20e   :  { %v647_v42 = vpop.f32.mrf.mxu1  ;;  %v772_v58 = vpop.f32.mrf.mxu0 }
 0x20f   :  { %v753_v63 = vadd.f32 %v752_v45, %v647_v42 }
 0x210   :  { %v1456_v44 = vpop.f32.mrf.mxu1 }
 0x211   :  { %v768_v36 = vadd.f32 %v1500_v47, %v1456_v44 }
 0x212   :  { %v657_v46 = vpop.f32.mrf.mxu1 }
 0x213   :  { %v763_v38 = vadd.f32 %v762_v51, %v657_v46 }
 0x214   :  { %v1459_v48 = vpop.f32.mrf.mxu1 }
 0x215   :  { %v778_v40 = vadd.f32 %v1503_v26, %v1459_v48 }
 0x216   :  { %v667_v52 = vpop.f32.mrf.mxu1 }
 0x217   :  { %v773_v16 = vadd.f32 %v772_v58, %v667_v52 }
 0x228   :  { %v1538_v54 = vpop.f32.mrf.mxu1 }
 0x229   :  { %v912_v55 = vadd.f32 %v1538_v54, %v748_v53 }
 0x22a   :  { %v872_v56 = vpop.f32.mrf.mxu1 }
 0x22b   :  { %v927_v59 = vadd.f32 %v1114_v27, %v912_v55  ;;  %v911_v60 = vadd.f32 %v872_v56, %v743_v28 }
 0x22c   :  { %v1541_v62 = vpop.f32.mrf.mxu1 }
 0x22d   :  { %v935_v0 = vmax.f32 %v927_v59, 0.0  ;;  %v926_v1 = vadd.f32 %v1114_v27, %v911_v60  ;;  %v914_v49 = vadd.f32 %v1541_v62, %v758_v57  ;;  %v1582_v2 = vpop.f32.mrf.mxu0 }
 0x22e   :  { %v1037_v3 = vadd.f32 %v1582_v2, %v1949_v61  ;;  %v882_v4 = vpop.f32.mrf.mxu1 }
 0x22f   :  { %v934_v5 = vmax.f32 %v926_v1, 0.0  ;;  %v929_v6 = vadd.f32 %v1114_v27, %v914_v49  ;;  %v913_v7 = vadd.f32 %v882_v4, %v753_v63  ;;  %v1031_v8 = vpop.f32.mrf.mxu0 }
 0x230   :  { %v1071_v9 = vadd.f32 %v1037_v3, %v935_v0  ;;  %v1032_v10 = vadd.f32 %v1949_v61, %v1031_v8 }
 0x231   :  { %v937_v11 = vmax.f32 %v929_v6, 0.0  ;;  %v928_v12 = vadd.f32 %v1114_v27, %v913_v7  ;;  %v1544_v33 = vpop.f32.mrf.mxu1 }
 0x232   :  { %v1079_v13 = vmax.f32 %v1071_v9, 0.0  ;;  %v1070_v14 = vadd.f32 %v1032_v10, %v934_v5  ;;  %v1585_v17 = vpop.f32.mrf.mxu0  ;;  %v916_v39 = vadd.f32 %v1544_v33, %v768_v36 }
 0x233   :  { %v936_v18 = vmax.f32 %v928_v12, 0.0  ;;  %v1047_v19 = vadd.f32 %v1585_v17, %v1949_v61  ;;  %v892_v35 = vpop.f32.mrf.mxu1 }
 0x234   :  { %1087 = vst [vmem:[#allocation12 + $0x8] sm:$0xff] %v1079_v13  ;;  %v1078_v20 = vmax.f32 %v1070_v14, 0.0  ;;  %v1041_v24 = vpop.f32.mrf.mxu0  ;;  %v915_v50 = vadd.f32 %v892_v35, %v763_v38  ;;  %v931_v21 = vadd.f32 %v1114_v27, %v916_v39 }
 0x235   :  { %v1073_v25 = vadd.f32 %v1047_v19, %v937_v11  ;;  %v1042_v29 = vadd.f32 %v1949_v61, %v1041_v24 }
 0x236   :  { %1086 = vst [vmem:[#allocation12] sm:$0xff] %v1078_v20  ;;  %v1547_v37 = vpop.f32.mrf.mxu1  ;;  %v930_v23 = vadd.f32 %v1114_v27, %v915_v50  ;;  %v939_v42 = vmax.f32 %v931_v21, 0.0 }
 0x237   :  { %v1081_v30 = vmax.f32 %v1073_v25, 0.0  ;;  %v1072_v31 = vadd.f32 %v1042_v29, %v936_v18  ;;  %v918_v22 = vadd.f32 %v1547_v37, %v778_v40 }
 0x238   :  { %v902_v15 = vpop.f32.mrf.mxu1  ;;  %v938_v54 = vmax.f32 %v930_v23, 0.0 }
 0x239   :  { %1089 = vst [vmem:[#allocation12 + $0x18] sm:$0xff] %v1081_v30  ;;  %v1080_v32 = vmax.f32 %v1072_v31, 0.0  ;;  %v917_v34 = vadd.f32 %v902_v15, %v773_v16  ;;  %v933_v43 = vadd.f32 %v1114_v27, %v918_v22 }
 0x23b   :  { %1088 = vst [vmem:[#allocation12 + $0x10] sm:$0xff] %v1080_v32  ;;  %v932_v28 = vadd.f32 %v1114_v27, %v917_v34  ;;  %v941_v48 = vmax.f32 %v933_v43, 0.0 }
 0x23d   :  { %v940_v56 = vmax.f32 %v932_v28, 0.0 }
 0x24a   :  { %v1588_v41 = vpop.f32.mrf.mxu1 }
 0x24b   :  { %v1057_v45 = vadd.f32 %v1588_v41, %v1949_v61 }
 0x24c   :  { %v1051_v53 = vpop.f32.mrf.mxu1 }
 0x24d   :  { %v1075_v44 = vadd.f32 %v1057_v45, %v939_v42  ;;  %v1052_v46 = vadd.f32 %v1949_v61, %v1051_v53 }
 0x24e   :  { %v1591_v47 = vpop.f32.mrf.mxu1 }
 0x24f   :  { %v1083_v51 = vmax.f32 %v1075_v44, 0.0  ;;  %v1074_v26 = vadd.f32 %v1052_v46, %v938_v54  ;;  %v1067_v52 = vadd.f32 %v1591_v47, %v1949_v61 }
 0x250   :  { %v1061_v55 = vpop.f32.mrf.mxu1 }
 0x251   :  { %1091 = vst [vmem:[#allocation12 + $0x28] sm:$0xff] %v1083_v51  ;;  %v1082_v57 = vmax.f32 %v1074_v26, 0.0  ;;  %v1077_v58 = vadd.f32 %v1067_v52, %v941_v48  ;;  %v1062_v59 = vadd.f32 %v1949_v61, %v1061_v55 }
 0x253   :  { %1090 = vst [vmem:[#allocation12 + $0x20] sm:$0xff] %v1082_v57  ;;  %v1085_v27 = vmax.f32 %v1077_v58, 0.0  ;;  %v1076_v60 = vadd.f32 %v1062_v59, %v940_v56 }
 0x255   :  { %1093 = vst [vmem:[#allocation12 + $0x38] sm:$0xff] %v1085_v27  ;;  %v1084_v62 = vmax.f32 %v1076_v60, 0.0 }
 0x257   :  { %1092 = vst [vmem:[#allocation12 + $0x30] sm:$0xff] %v1084_v62 }
 0x258   :  { %1723 = shalt.err (!%p1720_p10)
}
 0x259   :  { %1105 = dma.vmem_to_hbm [thread:$0]  %s1100_s6, 1024, %s1972_s7, [#allocation6], %s1742_s29, %s1742_s29, %s1743_s30  }
 0x25a   :  { %1738 = dma.done.wait [#allocation6], 1024  }
 0x25b   :  { %1739 = vsyncadd [#allocation6], 4294966272 }
 0x25c   :  { %1109 = vsyncpa [#allocation5], 1 }
 0x25d   :  { %1110 = vsyncpa [#allocation8], 1 }
 0x25e   :  { %1111 = vsyncpa [#allocation11], 1 }
 0x25f   :  { %1112 = vsyncpa [#allocation6], 1 }

</bundles_post_ra>
